<compile_context>
chip_gen: v7x
topology: tpu7x:2x2x1
jax: 0.10.0
libtpu: 0.0.40
codegen_flags: <defaults>
</compile_context>

<pallas_src>
import math

import jax
import jax.numpy as jnp
from jax.experimental import pallas as pl
from jax.experimental.pallas import tpu as pltpu

GRU_INPUT = 32          # gru_input_size (== embedding dim == float2bin vec_size)
GRU_HIDDEN = 32         # gru_hidden_size
VOCAB = 100             # input_size (vocab for the embedding)
PACK = 4 * GRU_HIDDEN   # 128-lane packed output row  [h | tim | fc2-act]
MAX_CHUNK = 64          # tokens per grid step; VMEM-safe on v5e/v6e/v7x

# Row offsets of each constant inside the packed (SLAB_ROWS, 128) weight slab.
ROW_WG = 0        # (64, 128)  fused GRU gate weight acting on [x | h]
ROW_STILE = 64    # (16, 128)  channel -> lane spread matrix (flatten helper)
ROW_MSEL = 80     # (15, 128)  pooled-time row-selection mask (flatten helper)
ROW_BG = 96       # (1, 128)   fused GRU gate bias
ROW_WFC = 104     # (128, 32)  fc(128 -> 32), PyTorch flatten order folded in
ROW_BFC = 232     # (1, 32)
ROW_WFC2 = 240    # (32, 64)   fc2(32 -> 64)
ROW_BFC2 = 272    # (1, 64)
ROW_WOUT = 280    # (1, 64)    out(64 -> 1) weight row (VPU head)
ROW_BOUT = 288    # (1, 32)    out bias, broadcast across 32 lanes
ROW_W2K = 296     # (24, 16)   conv2 taps stacked [k0 | k1 | k2] along rows
ROW_B2 = 320      # (1, 16)
ROW_W1 = 328      # (3, 8)     conv1 taps (im2col form)
ROW_B1 = 336      # (1, 8)
SLAB_ROWS = 344


# ---------------------------------------------------------------------------
# Fused chunk kernel: per grid step process CHUNK tokens with an inner loop.
# Carried state: xh_scr (1, 64) = [current token's xg | GRU hidden].
# ---------------------------------------------------------------------------
def encoder_chunk_kernel(flags_ref, xg_ref, p1_ref, h0_ref, slab_ref,
                         out_ref, xh_scr):
    f32 = jnp.float32
    G, H = GRU_INPUT, GRU_HIDDEN
    chunk = out_ref.shape[0]
    chunk_id = pl.program_id(0)

    # First chunk: seed the carried hidden half of the [x | h] scratch.
    @pl.when(chunk_id == 0)
    def _init_hidden():
        xh_scr[:, G:] = h0_ref[...]

    # Loop-invariant weight slices out of the packed constant slab (hoisted).
    wg = slab_ref[ROW_WG:ROW_WG + 2 * H, :]
    bg = slab_ref[ROW_BG:ROW_BG + 1, :]
    s_tile = slab_ref[ROW_STILE:ROW_STILE + 16, :]
    m_sel = slab_ref[ROW_MSEL:ROW_MSEL + 15, :]
    wfc = slab_ref[ROW_WFC:ROW_WFC + 128, 0:G]
    bfc = slab_ref[ROW_BFC:ROW_BFC + 1, 0:G]
    wfc2 = slab_ref[ROW_WFC2:ROW_WFC2 + H, 0:64]
    bfc2 = slab_ref[ROW_BFC2:ROW_BFC2 + 1, 0:64]
    wout = slab_ref[ROW_WOUT:ROW_WOUT + 1, 0:64]
    bout = slab_ref[ROW_BOUT:ROW_BOUT + 1, 0:H]
    w2k0 = slab_ref[ROW_W2K:ROW_W2K + 8, 0:16]
    w2k1 = slab_ref[ROW_W2K + 8:ROW_W2K + 16, 0:16]
    w2k2 = slab_ref[ROW_W2K + 16:ROW_W2K + 24, 0:16]
    b2 = slab_ref[ROW_B2:ROW_B2 + 1, 0:16]
    w1 = slab_ref[ROW_W1:ROW_W1 + 3, 0:8]
    b1 = slab_ref[ROW_B1:ROW_B1 + 1, 0:8]

    @pl.loop(0, chunk)
    def _token(t):
        tok = chunk_id * chunk + t

        # Default xg: precomputed embedding / float2bin row for this token.
        xh_scr[:, 0:G] = xg_ref[t]

        # String branch: conv1 -> pool -> conv2 -> pool -> fc -> relu.
        @pl.when(flags_ref[tok] == 1)
        def _string_branch():
            # (36,3) im2col: rows 0:18 = even window starts, 18:36 = odd.
            p1 = p1_ref[t]
            y1 = jnp.maximum(
                jnp.dot(p1, w1, preferred_element_type=f32) + b1, 0.0)      # (36, 8)
            h1 = jnp.maximum(y1[0:18, :], y1[18:36, :])                     # pool1 (18, 8)
            # conv2 (8->16, k=3) via three shifted time slices.
            y2 = jnp.maximum(
                jnp.dot(h1[0:16, :], w2k0, preferred_element_type=f32)
                + jnp.dot(h1[1:17, :], w2k1, preferred_element_type=f32)
                + jnp.dot(h1[2:18, :], w2k2, preferred_element_type=f32)
                + b2, 0.0)                                                  # (16, 16)
            # pool2: adjacent-row max; valid pooled rows are the even rows.
            m = jnp.maximum(y2[0:15, :], y2[1:16, :])                       # (15, 16)
            # Row-major flatten into one lane-dense (1,128) row:
            # spread channels to lanes, mask odd rows, sublane-sum.
            spread = jnp.dot(m, s_tile, preferred_element_type=f32) * m_sel
            flat = jnp.sum(spread, axis=0, keepdims=True)                   # (1, 128)
            # fc(128 -> 32) + relu (PyTorch channel-major flatten folded in).
            xh_scr[:, 0:G] = jnp.maximum(
                jnp.dot(flat, wfc, preferred_element_type=f32) + bfc, 0.0)

        # GRU cell: one fused (1,64)@(64,128) gate dot on [x | h].
        xh = xh_scr[...]                      # (1, 64)
        h = xh[:, G:]                         # (1, 32)
        g = jnp.dot(xh, wg, preferred_element_type=f32) + bg                # (1, 128)
        r = jax.nn.sigmoid(g[:, 0:H])
        z = jax.nn.sigmoid(g[:, H:2 * H])
        n = jnp.tanh(g[:, 2 * H:3 * H] + r * g[:, 3 * H:4 * H])
        h_new = (1.0 - z) * n + z * h
        xh_scr[:, G:] = h_new

        # Head: fc2 -> relu, then out(64->1) as VPU multiply + lane reduce.
        t_act = jnp.maximum(
            jnp.dot(h_new, wfc2, preferred_element_type=f32) + bfc2, 0.0)   # (1, 64)
        tim = jnp.sum(t_act * wout, axis=1, keepdims=True) + bout           # (1, 32)

        # Single lane-dense 128-wide store: [h_new | tim | fc2-act].
        out_ref[t] = jnp.concatenate([h_new, tim, t_act], axis=1)


# ---------------------------------------------------------------------------
# pallas_call wrapper: one call per token sequence, chunked grid
# ---------------------------------------------------------------------------
def _encode_sequence_call(slab, flags, xg_dir, p1s, h0, chunk):
    t_pad = xg_dir.shape[0]
    grid_spec = pltpu.PrefetchScalarGridSpec(
        num_scalar_prefetch=1,
        grid=(t_pad // chunk,),
        in_specs=[pl.BlockSpec((chunk, 1, GRU_INPUT), lambda c, fl: (c, 0, 0)),
                  pl.BlockSpec((chunk, 36, 3), lambda c, fl: (c, 0, 0)),
                  pl.BlockSpec((1, GRU_HIDDEN), lambda c, fl: (0, 0)),
                  pl.BlockSpec((SLAB_ROWS, 128), lambda c, fl: (0, 0))],
        out_specs=pl.BlockSpec((chunk, 1, PACK), lambda c, fl: (c, 0, 0)),
        scratch_shapes=[pltpu.VMEM((1, 2 * GRU_HIDDEN), jnp.float32)],  # [x | h]
    )
    return pl.pallas_call(
        encoder_chunk_kernel,
        grid_spec=grid_spec,
        out_shape=jax.ShapeDtypeStruct((t_pad, 1, PACK), jnp.float32),
        compiler_params=pltpu.CompilerParams(
            dimension_semantics=("arbitrary",)),      # sequential GRU recurrence
    )(flags, xg_dir, p1s, h0, slab)


# ---------------------------------------------------------------------------
# Parameters (deterministic, synthetic) packed into one VMEM slab
# ---------------------------------------------------------------------------
def init_params(key, vocab=VOCAB, G=GRU_INPUT, H=GRU_HIDDEN):
    ks = jax.random.split(key, 15)
    f32 = jnp.float32

    def u(k, shape, s=0.2):
        return jax.random.uniform(k, shape, f32, -s, s)

    emb = u(ks[0], (vocab, G))
    conv1_w = u(ks[1], (8, 1, 3));  conv1_b = u(ks[2], (8,))
    conv2_w = u(ks[3], (16, 8, 3)); conv2_b = u(ks[4], (16,))
    fc_w = u(ks[5], (G, 128));      fc_b = u(ks[6], (G,))
    wih = u(ks[7], (3 * H, G));     whh = u(ks[8], (3 * H, H))
    bih = u(ks[9], (3 * H,));       bhh = u(ks[10], (3 * H,))
    fc2_w = u(ks[11], (64, H));     fc2_b = u(ks[12], (64,))
    out_w = u(ks[13], (1, 64));     out_b = u(ks[14], (1,))

    # Fused GRU gate weight for [x | h]; PyTorch gate order [r, z, n].
    # g lanes: [0:H]=r, [H:2H]=z, [2H:3H]=W_in x + b_in, [3H:4H]=W_hn h + b_hn.
    wih_g = jnp.transpose(wih.reshape(3, H, G), (0, 2, 1))   # (3, G, H)
    whh_g = jnp.transpose(whh.reshape(3, H, H), (0, 2, 1))   # (3, H, H)
    wgx = jnp.concatenate([wih_g[0], wih_g[1], wih_g[2], jnp.zeros((G, H), f32)], axis=1)
    wgh = jnp.concatenate([whh_g[0], whh_g[1], jnp.zeros((H, H), f32), whh_g[2]], axis=1)
    wg = jnp.concatenate([wgx, wgh], axis=0)                 # (64, 128)
    bih_g = bih.reshape(3, H); bhh_g = bhh.reshape(3, H)
    bg = jnp.concatenate([bih_g[0] + bhh_g[0], bih_g[1] + bhh_g[1],
                          bih_g[2], bhh_g[2]])               # (128,)

    # Flatten helpers: spread pooled activations to lanes 16*w + c, mask odd
    # rows of the adjacent-max so flat[16*j + c] == h2[j, c].
    lane = jnp.arange(128)
    s_tile = ((lane[None, :] % 16) == jnp.arange(16)[:, None]).astype(f32)   # (16,128)
    w_idx = jnp.arange(15)[:, None]
    m_sel = (((lane[None, :] // 16) == (w_idx // 2)) & (w_idx % 2 == 0)).astype(f32)

    # fc(128->G): kernel flatten lane order is 16*w + c; PyTorch channel-major
    # flat index c*8 + w is folded in by reordering fc_w's columns.
    wfc = jnp.transpose(fc_w.reshape(G, 16, 8), (2, 1, 0)).reshape(128, G)

    # conv weights in time-major im2col form.
    w1 = jnp.transpose(conv1_w.reshape(8, 3), (1, 0))        # (3, 8)
    w2k = jnp.transpose(conv2_w, (2, 1, 0)).reshape(24, 16)  # rows [k0|k1|k2]

    slab = jnp.zeros((SLAB_ROWS, 128), f32)
    slab = slab.at[ROW_WG:ROW_WG + 2 * H, :].set(wg)
    slab = slab.at[ROW_STILE:ROW_STILE + 16, :].set(s_tile)
    slab = slab.at[ROW_MSEL:ROW_MSEL + 15, :].set(m_sel)
    slab = slab.at[ROW_BG, :].set(bg)
    slab = slab.at[ROW_WFC:ROW_WFC + 128, 0:G].set(wfc)
    slab = slab.at[ROW_BFC, 0:G].set(fc_b)
    slab = slab.at[ROW_WFC2:ROW_WFC2 + H, 0:64].set(fc2_w.T)
    slab = slab.at[ROW_BFC2, 0:64].set(fc2_b)
    slab = slab.at[ROW_WOUT, 0:64].set(out_w[0])
    slab = slab.at[ROW_BOUT, 0:H].set(jnp.full((H,), out_b[0], f32))
    slab = slab.at[ROW_W2K:ROW_W2K + 24, 0:16].set(w2k)
    slab = slab.at[ROW_B2, 0:16].set(conv2_b)
    slab = slab.at[ROW_W1:ROW_W1 + 3, 0:8].set(w1)
    slab = slab.at[ROW_B1, 0:8].set(conv1_b)

    return dict(embedding=emb, slab=slab)


# ---------------------------------------------------------------------------
# Host-side glue mirroring the PyTorch helpers (Python scalars/strings)
# ---------------------------------------------------------------------------
def string2tensor(ss, padding_to_size=38):
    # TODO(synk): strings longer than padding_to_size silently grow the list,
    # matching the reference; only chars 0..37 feed the conv windows below.
    lis = [0.0] * padding_to_size
    lis[:len(ss)] = [float(ord(c)) for c in ss]
    return jnp.array(lis, dtype=jnp.float32) / 128.0


def float2bin_tensor(num, vec_size=GRU_INPUT):
    eps = 1e-08
    num = float(num)
    deci, intg = math.modf(num)
    intg = int(intg)
    half_size = vec_size // 2
    intg_lis = [0] * half_size
    deci_lis = [0] * half_size
    for i in range(0, half_size):
        intg_lis[i] = intg % 2
        intg = intg // 2
        if intg <= 0:
            break
    for i in range(half_size - 1, 0, -1):
        deci = deci * 2
        deci, d = math.modf(deci)
        deci_lis[i] = int(d)
        if abs(deci) < eps:
            break
    return jnp.array(deci_lis + intg_lis, dtype=jnp.float32)


def _string_windows(x):
    # conv1 im2col with even/odd window starts pre-split so maxpool1d(2) is a
    # contiguous slice + VPU max inside the kernel (rows 0:18 even, 18:36 odd).
    win = jnp.stack([x[0:36], x[1:37], x[2:38]], axis=1)     # (36, 3)
    return jnp.concatenate([win[0::2], win[1::2]], axis=0)   # (36, 3)


def encode_sequence(params, tokens, hidden, max_chunk=MAX_CHUNK):
    """Runs EncoderRNN over a whole token sequence with one fused Pallas call.

    tokens: list of (input, tag).  hidden: (1,1,H) initial hidden state.
    Returns (outputs (T,1,1,H), final hidden (1,1,H), tim_outputs (T,1,1)).
    """
    f32 = jnp.float32
    T = len(tokens)
    zero_p1 = jnp.zeros((36, 3), f32)
    zero_xg = jnp.zeros((GRU_INPUT,), f32)
    xg_rows, p1_rows, flag_rows = [], [], []
    for inp, tag in tokens:
        # TODO(synk): tag dispatch / ord() / float->binary expansion operate on
        # Python objects and stay host-side; only tensors enter the kernel.
        if tag == 'identifier' or tag == 'keyword':
            xg_rows.append(params['embedding'][int(inp)])
            p1_rows.append(zero_p1); flag_rows.append(0)
        elif tag == 'number':
            xg_rows.append(float2bin_tensor(inp, vec_size=GRU_INPUT))
            p1_rows.append(zero_p1); flag_rows.append(0)
        elif tag == 'string':
            x = string2tensor(inp)
            p1_rows.append(_string_windows(x))
            xg_rows.append(zero_xg); flag_rows.append(1)
        else:
            raise Exception('not seen tag')

    # TODO(synk): p1s could be compacted to string-tagged tokens only (with a
    # scalar-prefetched offset per chunk); kept dense per-token for simplicity.
    chunk = min(max_chunk, T)
    n_chunks = -(-T // chunk)
    t_pad = n_chunks * chunk
    for _ in range(t_pad - T):      # padding tokens; output rows are discarded
        xg_rows.append(zero_xg); p1_rows.append(zero_p1); flag_rows.append(0)

    flags = jnp.array(flag_rows, jnp.int32)
    xg_dir = jnp.stack(xg_rows).reshape(t_pad, 1, GRU_INPUT).astype(f32)
    p1s = jnp.stack(p1_rows).astype(f32)
    h0 = hidden.reshape(1, GRU_HIDDEN).astype(f32)

    packed = _encode_sequence_call(params['slab'], flags, xg_dir, p1s, h0, chunk)
    h_all = packed[:T, 0, 0:GRU_HIDDEN]
    outputs = h_all.reshape(T, 1, 1, GRU_HIDDEN)
    hidden_new = h_all[T - 1].reshape(1, 1, GRU_HIDDEN)
    tim_outputs = packed[:T, 0, GRU_HIDDEN:GRU_HIDDEN + 1].reshape(T, 1, 1)
    return outputs, hidden_new, tim_outputs


def encoder_forward(params, inp, tag, hidden):
    """Single-token API parity with EncoderRNN.forward((inp, tag), hidden)."""
    outputs, hidden_new, tims = encode_sequence(params, [(inp, tag)], hidden)
    return outputs[0], hidden_new, tims[0]


if __name__ == "__main__":
    params = init_params(jax.random.PRNGKey(0))
    hidden = jnp.zeros((1, 1, GRU_HIDDEN), jnp.float32)

    # A small mixed-tag token sequence (string / identifier / number / keyword).
    # TODO(synk): batching >=2 independent sequences across sublanes / the
    # second v7x TensorCore (perf items #10/#11) needs a batched caller API.
    tokens = [
        ("select count(*) from users", 'string'),
        (7, 'identifier'),
        (3.14159, 'number'),
        ("where id = 1", 'string'),
        (42, 'keyword'),
        (2.5, 'number'),
        (13, 'identifier'),
        ("order by id desc", 'string'),
    ]

    # Whole sequence in ONE fused Pallas call (hidden carried in VMEM scratch).
    outputs, hidden_new, tim_outputs = encode_sequence(params, tokens, hidden)

    # Single-token API still available (chunk=1 instance of the same kernel).
    out_1, hid_1, tim_1 = encoder_forward(params, 99, 'identifier', hidden_new)

    jax.block_until_ready((outputs, hidden_new, tim_outputs, out_1, hid_1, tim_1))
    print("KERNEL_OK")
</pallas_src>

<mosaic_0001>
module attributes {stable_mosaic.version = 11 : i64} {
  func.func @encoder_chunk_kernel(%arg0: i32, %arg1: memref<8xi32, #tpu.memory_space<smem>>, %arg2: memref<8x1x32xf32, #tpu.memory_space<vmem>>, %arg3: memref<8x36x3xf32, #tpu.memory_space<vmem>>, %arg4: memref<1x32xf32, #tpu.memory_space<vmem>>, %arg5: memref<344x128xf32, #tpu.memory_space<vmem>>, %arg6: memref<8x1x128xf32, #tpu.memory_space<vmem>>, %arg7: memref<1x64xf32, #tpu.memory_space<vmem>>) attributes {dimension_semantics = [#tpu.dimension_semantics<arbitrary>], iteration_bounds = array<i64: 1>, scalar_prefetch = 1 : i64, scratch_operands = 1 : i64, tpu.core_type = #tpu.core_type<tc>, window_params = [{transform_indices = @transform_0, window_bounds = array<i64: 8, 1, 32>}, {transform_indices = @transform_1, window_bounds = array<i64: 8, 36, 3>}, {pipeline_mode = #tpu.pipeline_mode<synchronous>, transform_indices = @transform_2, window_bounds = array<i64: 1, 32>}, {pipeline_mode = #tpu.pipeline_mode<synchronous>, transform_indices = @transform_3, window_bounds = array<i64: 344, 128>}, {transform_indices = @transform_4, window_bounds = array<i64: 8, 1, 128>}]} {
    %c0_i32 = arith.constant 0 : i32
    %0 = arith.cmpi eq, %arg0, %c0_i32 : i32
    %1 = arith.extui %0 : i1 to i32
    %c0_i32_0 = arith.constant 0 : i32
    %2 = arith.cmpi ne, %1, %c0_i32_0 : i32
    scf.if %2 {
      %c0_19 = arith.constant 0 : index
      %c0_20 = arith.constant 0 : index
      %20 = vector.load %arg4[%c0_19, %c0_20] : memref<1x32xf32, #tpu.memory_space<vmem>>, vector<1x32xf32>
      %c0_21 = arith.constant 0 : index
      %c32 = arith.constant 32 : index
      %21 = vector.load %arg7[%c0_21, %c32] : memref<1x64xf32, #tpu.memory_space<vmem>>, vector<1x32xf32>
      tpu.vector_store %arg7[%c0_21, %c32], %20 {strides = array<i32>} : memref<1x64xf32, #tpu.memory_space<vmem>>, vector<1x32xf32>,
    } else {
    }
    %c0 = arith.constant 0 : index
    %c0_1 = arith.constant 0 : index
    %3 = vector.load %arg5[%c0, %c0_1] : memref<344x128xf32, #tpu.memory_space<vmem>>, vector<64x128xf32>
    %c96 = arith.constant 96 : index
    %c0_2 = arith.constant 0 : index
    %4 = vector.load %arg5[%c96, %c0_2] : memref<344x128xf32, #tpu.memory_space<vmem>>, vector<1x128xf32>
    %c64 = arith.constant 64 : index
    %c0_3 = arith.constant 0 : index
    %5 = vector.load %arg5[%c64, %c0_3] : memref<344x128xf32, #tpu.memory_space<vmem>>, vector<16x128xf32>
    %c80 = arith.constant 80 : index
    %c0_4 = arith.constant 0 : index
    %6 = vector.load %arg5[%c80, %c0_4] : memref<344x128xf32, #tpu.memory_space<vmem>>, vector<15x128xf32>
    %c104 = arith.constant 104 : index
    %c0_5 = arith.constant 0 : index
    %7 = vector.load %arg5[%c104, %c0_5] : memref<344x128xf32, #tpu.memory_space<vmem>>, vector<128x32xf32>
    %c232 = arith.constant 232 : index
    %c0_6 = arith.constant 0 : index
    %8 = vector.load %arg5[%c232, %c0_6] : memref<344x128xf32, #tpu.memory_space<vmem>>, vector<1x32xf32>
    %c240 = arith.constant 240 : index
    %c0_7 = arith.constant 0 : index
    %9 = vector.load %arg5[%c240, %c0_7] : memref<344x128xf32, #tpu.memory_space<vmem>>, vector<32x64xf32>
    %c272 = arith.constant 272 : index
    %c0_8 = arith.constant 0 : index
    %10 = vector.load %arg5[%c272, %c0_8] : memref<344x128xf32, #tpu.memory_space<vmem>>, vector<1x64xf32>
    %c280 = arith.constant 280 : index
    %c0_9 = arith.constant 0 : index
    %11 = vector.load %arg5[%c280, %c0_9] : memref<344x128xf32, #tpu.memory_space<vmem>>, vector<1x64xf32>
    %c288 = arith.constant 288 : index
    %c0_10 = arith.constant 0 : index
    %12 = vector.load %arg5[%c288, %c0_10] : memref<344x128xf32, #tpu.memory_space<vmem>>, vector<1x32xf32>
    %c296 = arith.constant 296 : index
    %c0_11 = arith.constant 0 : index
    %13 = vector.load %arg5[%c296, %c0_11] : memref<344x128xf32, #tpu.memory_space<vmem>>, vector<8x16xf32>
    %c304 = arith.constant 304 : index
    %c0_12 = arith.constant 0 : index
    %14 = vector.load %arg5[%c304, %c0_12] : memref<344x128xf32, #tpu.memory_space<vmem>>, vector<8x16xf32>
    %c312 = arith.constant 312 : index
    %c0_13 = arith.constant 0 : index
    %15 = vector.load %arg5[%c312, %c0_13] : memref<344x128xf32, #tpu.memory_space<vmem>>, vector<8x16xf32>
    %c320 = arith.constant 320 : index
    %c0_14 = arith.constant 0 : index
    %16 = vector.load %arg5[%c320, %c0_14] : memref<344x128xf32, #tpu.memory_space<vmem>>, vector<1x16xf32>
    %c328 = arith.constant 328 : index
    %c0_15 = arith.constant 0 : index
    %17 = vector.load %arg5[%c328, %c0_15] : memref<344x128xf32, #tpu.memory_space<vmem>>, vector<3x8xf32>
    %c336 = arith.constant 336 : index
    %c0_16 = arith.constant 0 : index
    %18 = vector.load %arg5[%c336, %c0_16] : memref<344x128xf32, #tpu.memory_space<vmem>>, vector<1x8xf32>
    %c0_i32_17 = arith.constant 0 : i32
    %c8_i32 = arith.constant 8 : i32
    %19 = arith.addi %c0_i32_17, %c8_i32 : i32
    %c1_i32 = arith.constant 1 : i32
    scf.for %arg8 = %c0_i32_17 to %19 step %c1_i32  : i32 {
      %c1_i32_19 = arith.constant 1 : i32
      %20 = arith.muli %arg8, %c1_i32_19 : i32
      %c0_i32_20 = arith.constant 0 : i32
      %21 = arith.addi %c0_i32_20, %20 : i32
      %c8_i32_21 = arith.constant 8 : i32
      %22 = arith.muli %arg0, %c8_i32_21 : i32
      %23 = arith.addi %22, %21 : i32
      %24 = arith.index_cast %21 : i32 to index
      %c0_22 = arith.constant 0 : index
      %c0_23 = arith.constant 0 : index
      %25 = vector.load %arg2[%24, %c0_22, %c0_23] : memref<8x1x32xf32, #tpu.memory_space<vmem>>, vector<1x1x32xf32>
      %26 = vector.shape_cast %25 : vector<1x1x32xf32> to vector<1x32xf32>
      %c0_24 = arith.constant 0 : index
      %c0_25 = arith.constant 0 : index
      %27 = vector.load %arg7[%c0_24, %c0_25] : memref<1x64xf32, #tpu.memory_space<vmem>>, vector<1x32xf32>
      tpu.vector_store %arg7[%c0_24, %c0_25], %26 {strides = array<i32>} : memref<1x64xf32, #tpu.memory_space<vmem>>, vector<1x32xf32>,
      %28 = arith.index_cast %23 : i32 to index
      %29 = memref.load %arg1[%28] : memref<8xi32, #tpu.memory_space<smem>>
      %c1_i32_26 = arith.constant 1 : i32
      %30 = arith.cmpi eq, %29, %c1_i32_26 : i32
      %31 = arith.extui %30 : i1 to i32
      %c0_i32_27 = arith.constant 0 : i32
      %32 = arith.cmpi ne, %31, %c0_i32_27 : i32
      scf.if %32 {
        %74 = arith.index_cast %21 : i32 to index
        %c0_39 = arith.constant 0 : index
        %c0_40 = arith.constant 0 : index
        %75 = vector.load %arg3[%74, %c0_39, %c0_40] : memref<8x36x3xf32, #tpu.memory_space<vmem>>, vector<1x36x3xf32>
        %76 = vector.shape_cast %75 : vector<1x36x3xf32> to vector<36x3xf32>
        %cst_41 = arith.constant dense<0.000000e+00> : vector<36x8xf32>
        %77 = tpu.matmul %76, %17, %cst_41 {dimension_numbers = #tpu.dot_dimension_numbers<[1], [0], [0], [1], [0, 0, 1, 1], [], []>} : vector<36x3xf32>, vector<3x8xf32>, vector<36x8xf32> -> vector<36x8xf32>
        %78 = vector.broadcast %18 : vector<1x8xf32> to vector<36x8xf32>
        %79 = arith.addf %77, %78 : vector<36x8xf32>
        %cst_42 = arith.constant 0.000000e+00 : f32
        %80 = vector.broadcast %cst_42 : f32 to vector<36x8xf32>
        %81 = arith.maximumf %79, %80 : vector<36x8xf32>
        %82 = vector.extract_strided_slice %81 {offsets = [0, 0], sizes = [18, 8], strides = [1, 1]} : vector<36x8xf32> to vector<18x8xf32>
        %83 = vector.extract_strided_slice %81 {offsets = [18, 0], sizes = [18, 8], strides = [1, 1]} : vector<36x8xf32> to vector<18x8xf32>
        %84 = arith.maximumf %82, %83 : vector<18x8xf32>
        %85 = vector.extract_strided_slice %84 {offsets = [0, 0], sizes = [16, 8], strides = [1, 1]} : vector<18x8xf32> to vector<16x8xf32>
        %cst_43 = arith.constant dense<0.000000e+00> : vector<16x16xf32>
        %86 = tpu.matmul %85, %13, %cst_43 {dimension_numbers = #tpu.dot_dimension_numbers<[1], [0], [0], [1], [0, 0, 1, 1], [], []>} : vector<16x8xf32>, vector<8x16xf32>, vector<16x16xf32> -> vector<16x16xf32>
        %87 = vector.extract_strided_slice %84 {offsets = [1, 0], sizes = [16, 8], strides = [1, 1]} : vector<18x8xf32> to vector<16x8xf32>
        %cst_44 = arith.constant dense<0.000000e+00> : vector<16x16xf32>
        %88 = tpu.matmul %87, %14, %cst_44 {dimension_numbers = #tpu.dot_dimension_numbers<[1], [0], [0], [1], [0, 0, 1, 1], [], []>} : vector<16x8xf32>, vector<8x16xf32>, vector<16x16xf32> -> vector<16x16xf32>
        %89 = arith.addf %86, %88 : vector<16x16xf32>
        %90 = vector.extract_strided_slice %84 {offsets = [2, 0], sizes = [16, 8], strides = [1, 1]} : vector<18x8xf32> to vector<16x8xf32>
        %cst_45 = arith.constant dense<0.000000e+00> : vector<16x16xf32>
        %91 = tpu.matmul %90, %15, %cst_45 {dimension_numbers = #tpu.dot_dimension_numbers<[1], [0], [0], [1], [0, 0, 1, 1], [], []>} : vector<16x8xf32>, vector<8x16xf32>, vector<16x16xf32> -> vector<16x16xf32>
        %92 = arith.addf %89, %91 : vector<16x16xf32>
        %93 = vector.broadcast %16 : vector<1x16xf32> to vector<16x16xf32>
        %94 = arith.addf %92, %93 : vector<16x16xf32>
        %cst_46 = arith.constant 0.000000e+00 : f32
        %95 = vector.broadcast %cst_46 : f32 to vector<16x16xf32>
        %96 = arith.maximumf %94, %95 : vector<16x16xf32>
        %97 = vector.extract_strided_slice %96 {offsets = [0, 0], sizes = [15, 16], strides = [1, 1]} : vector<16x16xf32> to vector<15x16xf32>
        %98 = vector.extract_strided_slice %96 {offsets = [1, 0], sizes = [15, 16], strides = [1, 1]} : vector<16x16xf32> to vector<15x16xf32>
        %99 = arith.maximumf %97, %98 : vector<15x16xf32>
        %cst_47 = arith.constant dense<0.000000e+00> : vector<15x128xf32>
        %100 = tpu.matmul %99, %5, %cst_47 {dimension_numbers = #tpu.dot_dimension_numbers<[1], [0], [0], [1], [0, 0, 1, 1], [], []>} : vector<15x16xf32>, vector<16x128xf32>, vector<15x128xf32> -> vector<15x128xf32>
        %101 = arith.mulf %100, %6 : vector<15x128xf32>
        %cst_48 = arith.constant dense<0.000000e+00> : vector<128xf32>
        %102 = vector.multi_reduction <add>, %101, %cst_48 [0] : vector<15x128xf32> to vector<128xf32>
        %103 = vector.shape_cast %102 : vector<128xf32> to vector<1x128xf32>
        %cst_49 = arith.constant dense<0.000000e+00> : vector<1x32xf32>
        %104 = tpu.matmul %103, %7, %cst_49 {dimension_numbers = #tpu.dot_dimension_numbers<[1], [0], [0], [1], [0, 0, 1, 1], [], []>} : vector<1x128xf32>, vector<128x32xf32>, vector<1x32xf32> -> vector<1x32xf32>
        %105 = arith.addf %104, %8 : vector<1x32xf32>
        %cst_50 = arith.constant 0.000000e+00 : f32
        %106 = vector.broadcast %cst_50 : f32 to vector<1x32xf32>
        %107 = arith.maximumf %105, %106 : vector<1x32xf32>
        %c0_51 = arith.constant 0 : index
        %c0_52 = arith.constant 0 : index
        %108 = vector.load %arg7[%c0_51, %c0_52] : memref<1x64xf32, #tpu.memory_space<vmem>>, vector<1x32xf32>
        tpu.vector_store %arg7[%c0_51, %c0_52], %107 {strides = array<i32>} : memref<1x64xf32, #tpu.memory_space<vmem>>, vector<1x32xf32>,
      } else {
      }
      %c0_28 = arith.constant 0 : index
      %c0_29 = arith.constant 0 : index
      %33 = vector.load %arg7[%c0_28, %c0_29] : memref<1x64xf32, #tpu.memory_space<vmem>>, vector<1x64xf32>
      %34 = vector.extract_strided_slice %33 {offsets = [0, 32], sizes = [1, 32], strides = [1, 1]} : vector<1x64xf32> to vector<1x32xf32>
      %cst = arith.constant dense<0.000000e+00> : vector<1x128xf32>
      %35 = tpu.matmul %33, %3, %cst {dimension_numbers = #tpu.dot_dimension_numbers<[1], [0], [0], [1], [0, 0, 1, 1], [], []>} : vector<1x64xf32>, vector<64x128xf32>, vector<1x128xf32> -> vector<1x128xf32>
      %36 = arith.addf %35, %4 : vector<1x128xf32>
      %37 = vector.extract_strided_slice %36 {offsets = [0, 0], sizes = [1, 32], strides = [1, 1]} : vector<1x128xf32> to vector<1x32xf32>
      %38 = arith.negf %37 : vector<1x32xf32>
      %39 = math.exp %38 : vector<1x32xf32>
      %cst_30 = arith.constant 1.000000e+00 : f32
      %40 = vector.broadcast %cst_30 : f32 to vector<1x32xf32>
      %41 = arith.addf %40, %39 : vector<1x32xf32>
      %42 = arith.divf %40, %41 : vector<1x32xf32>
      %43 = vector.extract_strided_slice %36 {offsets = [0, 32], sizes = [1, 32], strides = [1, 1]} : vector<1x128xf32> to vector<1x32xf32>
      %44 = arith.negf %43 : vector<1x32xf32>
      %45 = math.exp %44 : vector<1x32xf32>
      %cst_31 = arith.constant 1.000000e+00 : f32
      %46 = vector.broadcast %cst_31 : f32 to vector<1x32xf32>
      %47 = arith.addf %46, %45 : vector<1x32xf32>
      %48 = arith.divf %46, %47 : vector<1x32xf32>
      %49 = vector.extract_strided_slice %36 {offsets = [0, 64], sizes = [1, 32], strides = [1, 1]} : vector<1x128xf32> to vector<1x32xf32>
      %50 = vector.extract_strided_slice %36 {offsets = [0, 96], sizes = [1, 32], strides = [1, 1]} : vector<1x128xf32> to vector<1x32xf32>
      %51 = arith.mulf %42, %50 : vector<1x32xf32>
      %52 = arith.addf %49, %51 : vector<1x32xf32>
      %53 = math.tanh %52 : vector<1x32xf32>
      %cst_32 = arith.constant 1.000000e+00 : f32
      %54 = vector.broadcast %cst_32 : f32 to vector<1x32xf32>
      %55 = arith.subf %54, %48 : vector<1x32xf32>
      %56 = arith.mulf %55, %53 : vector<1x32xf32>
      %57 = arith.mulf %48, %34 : vector<1x32xf32>
      %58 = arith.addf %56, %57 : vector<1x32xf32>
      %c0_33 = arith.constant 0 : index
      %c32 = arith.constant 32 : index
      %59 = vector.load %arg7[%c0_33, %c32] : memref<1x64xf32, #tpu.memory_space<vmem>>, vector<1x32xf32>
      tpu.vector_store %arg7[%c0_33, %c32], %58 {strides = array<i32>} : memref<1x64xf32, #tpu.memory_space<vmem>>, vector<1x32xf32>,
      %cst_34 = arith.constant dense<0.000000e+00> : vector<1x64xf32>
      %60 = tpu.matmul %58, %9, %cst_34 {dimension_numbers = #tpu.dot_dimension_numbers<[1], [0], [0], [1], [0, 0, 1, 1], [], []>} : vector<1x32xf32>, vector<32x64xf32>, vector<1x64xf32> -> vector<1x64xf32>
      %61 = arith.addf %60, %10 : vector<1x64xf32>
      %cst_35 = arith.constant 0.000000e+00 : f32
      %62 = vector.broadcast %cst_35 : f32 to vector<1x64xf32>
      %63 = arith.maximumf %61, %62 : vector<1x64xf32>
      %64 = arith.mulf %63, %11 : vector<1x64xf32>
      %cst_36 = arith.constant dense<0.000000e+00> : vector<1xf32>
      %65 = vector.multi_reduction <add>, %64, %cst_36 [1] : vector<1x64xf32> to vector<1xf32>
      %66 = vector.shape_cast %65 : vector<1xf32> to vector<1x1xf32>
      %67 = vector.broadcast %66 : vector<1x1xf32> to vector<1x32xf32>
      %68 = arith.addf %67, %12 : vector<1x32xf32>
      %69 = tpu.concatenate %58, %68, %63 in 1 : vector<1x32xf32>, vector<1x32xf32>, vector<1x64xf32> -> vector<1x128xf32>
      %70 = arith.index_cast %21 : i32 to index
      %c0_37 = arith.constant 0 : index
      %c0_38 = arith.constant 0 : index
      %71 = vector.load %arg6[%70, %c0_37, %c0_38] : memref<8x1x128xf32, #tpu.memory_space<vmem>>, vector<1x1x128xf32>
      %72 = vector.shape_cast %71 : vector<1x1x128xf32> to vector<1x128xf32>
      %73 = vector.shape_cast %69 : vector<1x128xf32> to vector<1x1x128xf32>
      tpu.vector_store %arg6[%70, %c0_37, %c0_38], %73 {strides = array<i32>} : memref<8x1x128xf32, #tpu.memory_space<vmem>>, vector<1x1x128xf32>,
    }
    %c8_i32_18 = arith.constant 8 : i32
    return
  }
  func.func @transform_0(%arg0: i32, %arg1: memref<8xi32, #tpu.memory_space<smem>>) -> (i32, i32, i32) {
    %c0_i32 = arith.constant 0 : i32
    %c0_i32_0 = arith.constant 0 : i32
    %c0_i32_1 = arith.constant 0 : i32
    return %arg0, %c0_i32, %c0_i32_0 : i32, i32, i32
  }
  func.func @transform_1(%arg0: i32, %arg1: memref<8xi32, #tpu.memory_space<smem>>) -> (i32, i32, i32) {
    %c0_i32 = arith.constant 0 : i32
    %c0_i32_0 = arith.constant 0 : i32
    %c0_i32_1 = arith.constant 0 : i32
    return %arg0, %c0_i32, %c0_i32_0 : i32, i32, i32
  }
  func.func @transform_2(%arg0: i32, %arg1: memref<8xi32, #tpu.memory_space<smem>>) -> (i32, i32) {
    %c0_i32 = arith.constant 0 : i32
    %c0_i32_0 = arith.constant 0 : i32
    %c0_i32_1 = arith.constant 0 : i32
    return %c0_i32, %c0_i32_0 : i32, i32
  }
  func.func @transform_3(%arg0: i32, %arg1: memref<8xi32, #tpu.memory_space<smem>>) -> (i32, i32) {
    %c0_i32 = arith.constant 0 : i32
    %c0_i32_0 = arith.constant 0 : i32
    %c0_i32_1 = arith.constant 0 : i32
    return %c0_i32, %c0_i32_0 : i32, i32
  }
  func.func @transform_4(%arg0: i32, %arg1: memref<8xi32, #tpu.memory_space<smem>>) -> (i32, i32, i32) {
    %c0_i32 = arith.constant 0 : i32
    %c0_i32_0 = arith.constant 0 : i32
    %c0_i32_1 = arith.constant 0 : i32
    return %arg0, %c0_i32, %c0_i32_0 : i32, i32, i32
  }
}

</mosaic_0001>

<bundles_post_ra>
// kernel: tpu_custom_call.1
= control target key start
LH: loop header
LB: loop body
LE: loop exit
PB: predicated region body
PF: predicated region fallthrough
CT: control target
= control target key end

     0   :  { %s1581_s0 = inlined_call_operand.vmem [shape: s32[8], index: 0, kind: input, shape index: {}]   ;;  %s1582_s1 = inlined_call_operand.vmem [shape: f32[8,1,32], index: 1, kind: input, shape index: {}]   ;;  %s1583_s2 = inlined_call_operand.vmem [shape: f32[8,36,3], index: 2, kind: input, shape index: {}]   ;;  %s1584_s3 = inlined_call_operand.vmem [shape: f32[1,32], index: 3, kind: input, shape index: {}]   ;;  %s1585_s4 = inlined_call_operand.vmem [shape: f32[344,128], index: 4, kind: input, shape index: {}]   ;;  %s1586_s5 = inlined_call_operand.hbm [shape: f32[8,1,128], index: 5, kind: output, shape index: {}]  }
   0x1   :  { %s10_s20 = sshll.u32 %s1581_s0, 4  ;;  %s11_s20 = int_to_ptr.vmem [resolvable:$true] %s10_s20 }
   0x2   :  { %s1152_s21 = scalar_lea.vmem %s11_s20, 16  ;;  %p1157_p1 = scmp.lt.s32.totalorder %s11_s20, %s11_s20 }
   0x3   :  { %p1153_p0 = scmp.ne.s32.totalorder %s11_s20, %s1152_s21  ;;  %p1158_p2 = scmp.lt.s32.totalorder %s1152_s21, %s1152_s21 }
   0x5   :  { %p1159_p3 = por %p1158_p2, %p1157_p1 }
   0x7   :  { %p1160_p4 = pnand %p1159_p3, %p1153_p0 }
   0x9   :  { %1163 = shalt.err (!%p1160_p4)  }
   0xa   :  { %s1198_s22 = smov [#allocation4]  }
   0xb   :  { %13 = dma.vmem_to_smem %s11_s20, 16, %s1198_s22, [#allocation3] }
   0xc   :  { %1190 = dma.done.wait [#allocation3], 16 }
   0xd   :  { %1191 = vsyncadd [#allocation3], 4294967280 }
   0xe   :  { %15 = sfence }
   0xf   :  { %16 = vsyncpa [#allocation6], 0  ;;  %v899_v0 = vld [vmem:[%s1584_s3] ss:$0 sm:$0xff]  ;;  %s1199_s25 = smov 32   ;;  %v1256_v2 = vld [vmem:[%s1585_s4 + $0x8] sm:$0xff] }
  0x10   :  { %35 = vrot.lane.b32.xlu0 %v899_v0, %s1199_s25  ;;  %v1251_v1 = vld [vmem:[%s1585_s4] sm:$0xff]  ;;  %v1261_v3 = vld [vmem:[%s1585_s4 + $0x10] sm:$0xff]  ;;  %v1266_v4 = vld [vmem:[%s1585_s4 + $0x18] sm:$0xff]  ;;  %vm38_vm0 = vcmask 516352   ;;  %s1464_s30 = smov 0  }
  0x11   :  { %v1271_v5 = vld [vmem:[%s1585_s4 + $0x20] sm:$0xff]  ;;  %v1276_v6 = vld [vmem:[%s1585_s4 + $0x28] sm:$0xff]  ;;  %v1281_v7 = vld [vmem:[%s1585_s4 + $0x30] sm:$0xff] }
  0x12   :  { %v1286_v8 = vld [vmem:[%s1585_s4 + $0x38] sm:$0xff]  ;;  %v1291_v9 = vld [vmem:[%s1585_s4 + $0x60] sm:$0x1]  ;;  %v1301_v11 = vld [vmem:[%s1585_s4 + $0x48] sm:$0xff] }
  0x13   :  { %v1296_v10 = vld [vmem:[%s1585_s4 + $0x40] sm:$0xff]  ;;  %v1306_v12 = vld [vmem:[%s1585_s4 + $0x50] sm:$0xff]  ;;  %v1311_v13 = vld [vmem:[%s1585_s4 + $0x58] sm:$0x7f] }
  0x14   :  { %v1316_v14 = vld [vmem:[%s1585_s4 + $0x68] sm:$0xff]  ;;  %v1321_v15 = vld [vmem:[%s1585_s4 + $0x70] sm:$0xff]  ;;  %v1326_v16 = vld [vmem:[%s1585_s4 + $0x78] sm:$0xff] }
  0x15   :  { %v1331_v17 = vld [vmem:[%s1585_s4 + $0x80] sm:$0xff]  ;;  %v1336_v18 = vld [vmem:[%s1585_s4 + $0x88] sm:$0xff]  ;;  %v1341_v19 = vld [vmem:[%s1585_s4 + $0x90] sm:$0xff] }
  0x16   :  { %v1346_v20 = vld [vmem:[%s1585_s4 + $0x98] sm:$0xff]  ;;  %v1351_v21 = vld [vmem:[%s1585_s4 + $0xa0] sm:$0xff]  ;;  %v1356_v22 = vld [vmem:[%s1585_s4 + $0xa8] sm:$0xff] }
  0x17   :  { %v1361_v23 = vld [vmem:[%s1585_s4 + $0xb0] sm:$0xff]  ;;  %v1366_v24 = vld [vmem:[%s1585_s4 + $0xb8] sm:$0xff]  ;;  %v1371_v25 = vld [vmem:[%s1585_s4 + $0xc0] sm:$0xff] }
  0x18   :  { %v1376_v26 = vld [vmem:[%s1585_s4 + $0xc8] sm:$0xff]  ;;  %v1381_v27 = vld [vmem:[%s1585_s4 + $0xd0] sm:$0xff]  ;;  %v1386_v28 = vld [vmem:[%s1585_s4 + $0xd8] sm:$0xff] }
  0x19   :  { %v1391_v29 = vld [vmem:[%s1585_s4 + $0xe0] sm:$0xff]  ;;  %v1396_v30 = vld [vmem:[%s1585_s4 + $0xe8] sm:$0x1]  ;;  %v1401_v31 = vld [vmem:[%s1585_s4 + $0xf0] sm:$0xff] }
  0x1a   :  { %v1406_v32 = vld [vmem:[%s1585_s4 + $0xf8] sm:$0xff]  ;;  %v1411_v33 = vld [vmem:[%s1585_s4 + $0x100] sm:$0xff]  ;;  %v1416_v34 = vld [vmem:[%s1585_s4 + $0x108] sm:$0xff] }
  0x1b   :  { %v1421_v35 = vld [vmem:[%s1585_s4 + $0x110] sm:$0x1]  ;;  %v1426_v36 = vld [vmem:[%s1585_s4 + $0x118] sm:$0x1]  ;;  %v1431_v37 = vld [vmem:[%s1585_s4 + $0x120] sm:$0x1] }
  0x1c   :  { %v1436_v38 = vld [vmem:[%s1585_s4 + $0x128] sm:$0xff]  ;;  %v1441_v39 = vld [vmem:[%s1585_s4 + $0x130] sm:$0xff]  ;;  %v1446_v40 = vld [vmem:[%s1585_s4 + $0x138] sm:$0xff] }
  0x1d   :  { %v1451_v41 = vld [vmem:[%s1585_s4 + $0x140] ss:$0 sm:$0xff]  ;;  %v1456_v42 = vld [vmem:[%s1585_s4 + $0x148] sm:$0x7]  ;;  %v1461_v43 = vld [vmem:[%s1585_s4 + $0x150] ss:$0 sm:$0xff] }
  0x82   :  { %v36_v44 = vpop.permute.xlu0 %35 }
  0x83   :  { %39 = vst.msk [vmem:[#allocation2] sm:$0x1] %vm38_vm0, %v36_v44 }
  0x84 LB: > { %vm93_vm1 = vcmask 253952   ;;  %s91_s3 = scalar_lea.vmem %s1582_s1, %s1196_s30  ;;  %s95_s4 = sld [smem:[#allocation4 + %s1196_s30]]  ;;  %s1196_s30 = sphi %s1464_s30, %s88_s30  }
  0x85   : > { %v92_v45 = vld [vmem:[%s91_s3] sm:$0x1] }
  0x86   : > { %94 = vst.msk [vmem:[#allocation2] sm:$0x1] %vm93_vm1, %v92_v45 }
  0x8a   : > { %p900_p5 = scmp.ne.s32.totalorder %s95_s4, 1 }
  0x8b   : > { %vm127_vm2 = vcmask (!%p900_p5), 1042432   ;;  %s100_s8 = smul.u32 (!%p900_p5), 40, %s1196_s30  ;;  %987 = vmatprep.subr.mxu1 (!%p900_p5), %v1441_v39  ;;  %v1200_v46 = vmov (!%p900_p5), 0.0   ;;  %vm1201_vm3 = vmmov (!%p900_p5), 0   ;;  %vm111_vm4 = vcmask (!%p900_p5), 23552  }
  0x8c   : > { %99 = sbr.rel (%p900_p5) target bundleno = 1069 (0x42d), region = 32  ;;  %970 = vmatprep.subr.mxu0 (!%p900_p5), %v1200_v46  ;;  %972 = vmatprep.mubr.msk.f32.mxu0 (!%p900_p5), %vm1201_vm3, %v1200_v46  ;;  %vm229_vm5 = vcmask (!%p900_p5), 1045504   ;;  %vm244_vm6 = vcmask (!%p900_p5), 1046528   ;;  %vm250_vm7 = vcmask (!%p900_p5), 64512   ;;  %vm512_vm8 = vcmask (!%p900_p5), 130048  }
  0x8d   : > { %971 = vmatpush3.msk.msra.mxu0 (!%p900_p5), %vm127_vm2, %v1456_v42  ;;  %s101_s11 = scalar_lea.vmem (!%p900_p5), %s1583_s2, %s100_s8  ;;  %988 = vmatpush3.msra.mxu1 (!%p900_p5), %v1441_v39 }
  0x8e   : > { %v102_v47 = vld [vmem:[%s101_s11] sm:$0xff] (!%p900_p5)  ;;  %992 = vmatprep.subr.mxu1 (!%p900_p5), %v1436_v38  ;;  %v103_v48 = vld [vmem:[%s101_s11 + $0x8] sm:$0xff] (!%p900_p5)  ;;  %v104_v49 = vld [vmem:[%s101_s11 + $0x10] sm:$0xff] (!%p900_p5) }
  0x8f   : > { %973 = vmatmul.mubr.msk.f32.vlgmr.msra.gmra.mrb[0].mxu0 (!%p900_p5), %vm111_vm4, %v102_v47  ;;  %v105_v50 = vld [vmem:[%s101_s11 + $0x18] sm:$0xff] (!%p900_p5)  ;;  %v106_v51 = vld [vmem:[%s101_s11 + $0x20] sm:$0xf] (!%p900_p5) }
  0x90   : > { %975 = vmatprep.mubr.msk.f32.mxu0 (!%p900_p5), %vm1201_vm3, %v1200_v46 }
  0x93   : > { %976 = vmatmul.mubr.msk.f32.gmra.mrb[2].mxu0 %vm111_vm4, %v103_v48 }
  0x94   : > { %978 = vmatprep.mubr.msk.f32.mxu0 %vm1201_vm3, %v1200_v46 }
  0x97   : > { %979 = vmatmul.mubr.msk.f32.gmra.mrb[4].mxu0 %vm111_vm4, %v104_v49 }
  0x98   : > { %981 = vmatprep.mubr.msk.f32.mxu0 %vm1201_vm3, %v1200_v46 }
  0x9b   : > { %982 = vmatmul.mubr.msk.f32.gmra.mrb[6].mxu0 %vm111_vm4, %v105_v50 }
  0x9c   : > { %984 = vmatprep.mubr.msk.f32.mxu0 %vm1201_vm3, %v1200_v46 }
  0x9f   : > { %985 = vmatmul.mubr.msk.f32.gmra.mrb[8].mxu0 %vm111_vm4, %v106_v51 }
  0xa0   : > { %1041 = vmatprep.mubr.msk.f32.mxu0 %vm1201_vm3, %v1200_v46 }
 0x162   : > { %v197_v52 = vpop.f32.mrb[0].mxu0 }
 0x163   : > { %v974_v53 = vpop.f32.mrb[1].mxu0  ;;  %v198_v63 = vadd.f32 %v1461_v43, %v197_v52 }
 0x165   : > { %v221_v49 = vmax.f32 %v198_v63, 0.0 }
 0x166   : > { %v202_v54 = vpop.f32.mrb[2].mxu0 }
 0x167   : > { %v977_v55 = vpop.f32.mrb[3].mxu0  ;;  %v203_v50 = vadd.f32 %v1461_v43, %v202_v54 }
 0x16a   : > { %v207_v56 = vpop.f32.mrb[4].mxu0 }
 0x16b   : > { %v208_v57 = vadd.f32 %v1461_v43, %v207_v56  ;;  %v980_v58 = vpop.f32.mrb[5].mxu0 }
 0x16d   : > { %v223_v60 = vmax.f32 %v208_v57, 0.0  ;;  %v222_v57 = vmax.f32 %v203_v50, 0.0  ;;  %v1202_v50 = vmov 0.0|0.0  }
 0x16e   : > { %v212_v59 = vpop.f32.mrb[6].mxu0  ;;  %1078 = vmatprep.subr.bf16.mxu0 %v1202_v50 }
 0x16f   : > { %v213_v61 = vadd.f32 %v1461_v43, %v212_v59  ;;  %v983_v62 = vpop.f32.mrb[7].mxu0  ;;  %v230_v45 = vrot.slane %v223_v60, 2 }
 0x171   : > { %v224_v0 = vmax.f32 %v213_v61, 0.0 }
 0x172   : > { %v217_v44 = vpop.f32.mrb[8].mxu0 }
 0x173   : > { %v231_v46 = vrot.slane %v224_v0, 2  ;;  %v218_v47 = vadd.f32 %v1461_v43, %v217_v44  ;;  %v986_v48 = vpop.f32.mrb[9].mxu0 }
 0x175   : > { %v232_v51 = vsel %vm229_vm5, %v230_v45, %v231_v46  ;;  %v225_v53 = vmax.f32 %v218_v47, 0.0 }
 0x176   : > { %v238_v55 = vmax.f32 %v221_v49, %v232_v51  ;;  %v1082_v51 = vpack.c.bf16 %v1331_v17, %v1326_v16 }
 0x177   : > { %v233_v56 = vrot.slane %v225_v53, 2  ;;  %v1085_v53 = vpack.c.bf16 %v1341_v19, %v1336_v18 }
 0x178   : > { %v245_v0 = vrot.slane %v238_v55, 1  ;;  %v409_v48 = vrot.slane %v238_v55, 2 }
 0x179   : > { %v234_v58 = vsel %vm229_vm5, %v231_v46, %v233_v56  ;;  %v240_v52 = vmax.f32 %v223_v60, %v233_v56  ;;  %v1074_v60 = vpack.c.bf16 %v1301_v11, %v1296_v10  ;;  %v1079_v46 = vpack.c.bf16 %v1321_v15, %v1316_v14 }
 0x17a   : > { %v239_v59 = vmax.f32 %v222_v57, %v234_v58 }
 0x17b   : > { %v248_v61 = vrot.slane %v240_v52, 1  ;;  %v412_v62 = vrot.slane %v240_v52, 2  ;;  %1080 = vmatpush3.bf16.msra.mxu0 %v1079_v46 }
 0x17c   : > { %v246_v44 = vrot.slane %v239_v59, 1  ;;  %v410_v63 = vrot.slane %v239_v59, 2  ;;  %1081 = vmatprep.subr.bf16.mxu0 %v1202_v50 }
 0x17e   : > { %v247_v54 = vsel %vm244_vm6, %v245_v0, %v246_v44  ;;  %v249_v45 = vsel %vm244_vm6, %v246_v44, %v248_v61  ;;  %v411_v47 = vsel %vm229_vm5, %v409_v48, %v410_v63  ;;  %v413_v49 = vsel %vm229_vm5, %v410_v63, %v412_v62 }
 0x17f   : > { %989 = vmatprep.mubr.msk.f32.mxu1 %vm250_vm7, %v247_v54  ;;  %1083 = vmatpush3.bf16.msra.mxu0 %v1082_v51  ;;  %v1091_v54 = vpack.c.bf16 %v1361_v23, %v1356_v22 }
 0x180   : > { %990 = vmatmul.mubr.msk.f32.vlgmr.msra.gmra.mrb[0].mxu1 %vm250_vm7, %v249_v45  ;;  %1084 = vmatprep.subr.bf16.mxu0 %v1202_v50  ;;  %v1094_v45 = vpack.c.bf16 %v1371_v25, %v1366_v24 }
 0x181   : > { %993 = vmatpush3.msra.mxu1 %v1436_v38  ;;  %994 = vmatprep.mubr.msk.f32.mxu1 %vm250_vm7, %v238_v55  ;;  %v1088_v55 = vpack.c.bf16 %v1351_v21, %v1346_v20 }
 0x182   : > { %997 = vmatprep.subr.mxu1 %v1446_v40 }
 0x183   : > { %1086 = vmatpush3.bf16.msra.mxu0 %v1085_v53 }
 0x184   : > { %1087 = vmatprep.subr.bf16.mxu0 %v1202_v50 }
 0x187   : > { %1089 = vmatpush3.bf16.msra.mxu0 %v1088_v55 }
 0x188   : > { %995 = vmatmul.mubr.msk.f32.vlgmr.msra.gmra.mrb[0].mxu1 %vm250_vm7, %v239_v59  ;;  %1090 = vmatprep.subr.bf16.mxu0 %v1202_v50 }
 0x189   : > { %998 = vmatpush3.msra.mxu1 %v1446_v40  ;;  %999 = vmatprep.mubr.msk.f32.mxu1 %vm250_vm7, %v411_v47  ;;  %v1097_v47 = vpack.c.bf16 %v1381_v27, %v1376_v26 }
 0x18a   : > { %1075 = vmatprep.subr.bf16.mxu1 %v1074_v60 }
 0x18b   : > { %1092 = vmatpush3.bf16.msra.mxu0 %v1091_v54 }
 0x18c   : > { %1093 = vmatprep.subr.bf16.mxu0 %v1202_v50 }
 0x18f   : > { %1095 = vmatpush3.bf16.msra.mxu0 %v1094_v45 }
 0x190   : > { %1000 = vmatmul.mubr.msk.f32.vlgmr.msra.gmra.mrb[0].mxu1 %vm250_vm7, %v413_v49  ;;  %1096 = vmatprep.subr.bf16.mxu0 %v1202_v50  ;;  %v1100_v49 = vpack.c.bf16 %v1391_v29, %v1386_v28 }
 0x191   : > { %1077 = vmatpush3.bf16.msra.mxu1 %v1074_v60 }
 0x193   : > { %1098 = vmatpush3.bf16.msra.mxu0 %v1097_v47 }
 0x194   : > { %1099 = vmatprep.subr.bf16.mxu0 %v1202_v50 }
 0x197   : > { %1101 = vmatpush3.bf16.msra.mxu0 %v1100_v49 }
 0x263   : > { %v1001_v56 = vpop.f32.mrb[0].mxu1 }
 0x264   : > { %v500_v57 = vadd.f32 %v1001_v56, %v1451_v41  ;;  %v484_v58 = vpop.f32.mrb[1].mxu1 }
 0x265   : > { %v499_v52 = vadd.f32 %v1451_v41, %v484_v58 }
 0x266   : > { %v502_v59 = vmax.f32 %v500_v57, 0.0 }
 0x267   : > { %v501_v61 = vmax.f32 %v499_v52, 0.0 }
 0x268   : > { %v506_v62 = vrot.slane %v502_v59, 1 }
 0x269   : > { %v505_v0 = vrot.slane %v501_v61, 1 }
 0x26a   : > { %v511_v63 = vmax.f32 %v502_v59, %v506_v62 }
 0x26b   : > { %v507_v44 = vsel %vm244_vm6, %v505_v0, %v506_v62 }
 0x26c   : > { %v510_v48 = vmax.f32 %v501_v61, %v507_v44 }
 0x26e   : > { %1006 = vmatprep.mubr.msk.f32.mxu1 %vm512_vm8, %v510_v48 }
 0x26f   : > { %1007 = vmatmul.mubr.msk.f32.vlgmr.msra.gmra.mrb[2].mxu1 %vm512_vm8, %v511_v63 }
 0x342   : > { %v1008_v60 = vpop.f32.mrb[2].mxu1 }
 0x343   : > { %v595_v46 = vmul.f32 %v1008_v60, %v1311_v13  ;;  %v585_v51 = vpop.f32.mrb[3].mxu1 }
 0x344   : > { %v594_v53 = vmul.f32 %v585_v51, %v1306_v12 }
 0x345   : > { %v596_v55 = vsel %vm244_vm6, %v595_v46, 0.0 }
 0x346   : > { %v597_v56 = vadd.f32 %v596_v55, %v594_v53 }
 0x348   : > { %v598_v57 = vrot.slane %v597_v56, 4 }
 0x34a   : > { %v599_v58 = vadd.f32 %v598_v57, %v597_v56 }
 0x34c   : > { %v600_v52 = vrot.slane %v599_v58, 2 }
 0x34e   : > { %v601_v59 = vadd.f32 %v600_v52, %v599_v58 }
 0x350   : > { %v602_v61 = vrot.slane %v601_v59, 1 }
 0x352   : > { %v603_v62 = vadd.f32 %v602_v61, %v601_v59 }
 0x354   : > { %1042 = vmatmul.mubr.f32.vlgmr.msra.gmra.mrb[10].mxu0 %v603_v62 }
 0x427   : > { %v670_v50 = vpop.f32.mrb[10].mxu0 }
 0x428   : > { %v671_v0 = vadd.f32 %v670_v50, %v1396_v30  ;;  %v1043_v44 = vpop.f32.mrb[11].mxu0 }
 0x42a   : > { %v674_v48 = vmax.f32 %v671_v0, 0.0 }
 0x42c   : > { %675 = vst.msk [vmem:[#allocation2] sm:$0x1] %vm93_vm1, %v674_v48 }
 0x42d PF: > { %v1103_v63 = vpack.c.bf16 %v1256_v2, %v1251_v1  ;;  %v1203_v54 = vmov 0.0|0.0   ;;  %v1106_v45 = vpack.c.bf16 %v1266_v4, %v1261_v3  ;;  %vm1204_vm9 = vmmov 0   ;;  %s1206_s12 = smov 32   ;;  %s1207_s13 = smov 64  }
 0x42e   : > { %1102 = vmatprep.subr.bf16.mxu0 %v1203_v54  ;;  %1114 = vmatprep.subr.bf16.mxu1 %v1203_v54  ;;  %v1205_v47 = vmov 0.0   ;;  %v1109_v49 = vpack.c.bf16 %v1276_v6, %v1271_v5  ;;  %v1112_v60 = vpack.c.bf16 %v1286_v8, %v1281_v7  ;;  %vm677_vm10 = vcmask 523264   ;;  %s1208_s14 = smov 96   ;;  %s872_s15 = scalar_lea.vmem [#allocation5], %s1196_s30 }
 0x42f   : > { %1104 = vmatpush3.bf16.msra.mxu0 %v1103_v63  ;;  %1060 = vmatprep.mubr.msk.f32.mxu0 %vm1204_vm9, %v1205_v47  ;;  %v1115_v0 = vpack.c.bf16 %v1406_v32, %v1401_v31  ;;  %v1118_v44 = vpack.c.bf16 %v1416_v34, %v1411_v33  ;;  %vm781_vm11 = vcmask 261120   ;;  %vm856_vm12 = vcmask 516096   ;;  %s88_s30 = sadd.s32 1, %s1196_s30  }
 0x430   : > { %1105 = vmatprep.subr.bf16.mxu0 %v1203_v54  ;;  %1071 = vmatprep.mubr.msk.f32.mxu1 %vm1204_vm9, %v1205_v47  ;;  %p85_p6 = scmp.ge.s32.totalorder %s88_s30, 8  }
 0x431   : > { %1116 = vmatpush3.bf16.msra.mxu1 %v1115_v0  ;;  %s1209_s16 = smov (%p85_p6), [#allocation5]  }
 0x432   : > { %1117 = vmatprep.subr.bf16.mxu1 %v1203_v54  ;;  %s879_s17 = sshll.u32 (%p85_p6), %s1209_s16, 4  ;;  %s880_s17 = int_to_ptr.vmem [resolvable:$true] %s879_s17 }
 0x433   : > { %1107 = vmatpush3.bf16.msra.mxu0 %v1106_v45  ;;  %v676_v46 = vld [vmem:[#allocation2] sm:$0x1]  ;;  %s1164_s18 = scalar_lea.vmem (%p85_p6), %s880_s17, 128  ;;  %p1169_p8 = scmp.lt.s32.totalorder (%p85_p6), %s880_s17, %s880_s17 }
 0x434   : > { %1108 = vmatprep.subr.bf16.mxu0 %v1203_v54  ;;  %p1165_p7 = scmp.ne.s32.totalorder (%p85_p6), %s880_s17, %s1164_s18  ;;  %p1170_p9 = scmp.lt.s32.totalorder (%p85_p6), %s1164_s18, %s1164_s18 }
 0x435   : > { %1119 = vmatpush3.bf16.msra.mxu1 %v1118_v44 }
 0x436   :  { %p1171_p10 = por (%p85_p6), %p1170_p9, %p1169_p8 }
 0x437   : > { %1110 = vmatpush3.bf16.msra.mxu0 %v1109_v49 }
 0x438   : > { %1111 = vmatprep.subr.bf16.mxu0 %v1203_v54  ;;  %p1172_p11 = pnand (%p85_p6), %p1171_p10, %p1165_p7 }
 0x43b   : > { %1113 = vmatpush3.bf16.msra.mxu0 %v1112_v60 }
 0x43e   : > { %1061 = vmatmul.mubr.msk.f32.vlgmr.msra.gmra.mrb[0].mxu0 %vm677_vm10, %v676_v46 }
 0x511   : > { %v747_v51 = vpop.f32.mrb[0].mxu0 }
 0x512   : > { %v748_v53 = vadd.f32 %v747_v51, %v1291_v9  ;;  %v1062_v55 = vpop.f32.mrb[1].mxu0 }
 0x514   : > { %758 = vrot.lane.b32.xlu0 %v748_v53, %s1206_s12  ;;  %v918_v56 = vmul.f32 -1.442695, %v748_v53 }
 0x516   : > { %1146 = vpow2.f32 %v918_v56 }
 0x520   : > { %v1147_v57 = vpop.eup %1146 }
 0x521   : > { %v754_v58 = vadd.f32 1.0, %v1147_v57 }
 0x523   : > { %1148 = vrcp.f32 %v754_v58 }
 0x52d   : > { %v1149_v52 = vpop.eup %1148 }
 0x52e   : > { %v768_v63 = vsub.f32 1.0, %v1149_v52  ;;  %v774_v47 = vmul.f32 %v1149_v52, %v676_v46 }
 0x586   : > { %v759_v59 = vpop.permute.xlu0 %758 }
 0x587   : > { %v761_v61 = vmul.f32 %v1149_v52, %v759_v59 }
 0x589   : > { %763 = vrot.lane.b32.xlu0 %v761_v61, %s1207_s13 }
 0x5fb   : > { %v764_v62 = vpop.permute.xlu0 %763 }
 0x5fc   : > { %v766_v50 = vadd.f32 %v764_v62, %v748_v53 }
 0x5fe   : > { %1150 = vtanh.f32 %v766_v50 }
 0x608   : > { %v1151_v48 = vpop.eup %1150 }
 0x609   : > { %770 = vrot.lane.b32.xlu1 %v1151_v48, %s1208_s14 }
 0x67b   : > { %v771_v45 = vpop.permute.xlu1 %770 }
 0x67c   : > { %v773_v49 = vmul.f32 %v771_v45, %v768_v63 }
 0x67e   : > { %v775_v60 = vadd.f32 %v774_v47, %v773_v49 }
 0x680   : > { %777 = vst.msk [vmem:[#allocation2] sm:$0x1] %vm38_vm0, %v775_v60  ;;  %779 = vrot.lane.b32.xlu1 %v775_v60, %s1208_s14 }
 0x6f2   : > { %v780_v51 = vpop.permute.xlu1 %779 }
 0x6f3   : > { %1072 = vmatmul.mubr.msk.f32.vlgmr.msra.gmra.mrb[0].mxu1 %vm781_vm11, %v780_v51 }
 0x7c6   : > { %v850_v53 = vpop.f32.mrb[0].mxu1 }
 0x7c7   : > { %v851_v54 = vadd.f32 %v850_v53, %v1421_v35  ;;  %v1073_v55 = vpop.f32.mrb[1].mxu1 }
 0x7c9   : > { %v854_v56 = vmax.f32 %v851_v54, 0.0 }
 0x7cb   : > { %v855_v57 = vmul.f32 %v854_v56, %v1426_v36 }
 0x7cd   : > { %v857_v58 = vsel %vm856_vm12, %v855_v57, 0.0 }
 0x7ce   : > { %858 = vadd.xlane.f32.xlu0 %v857_v58 }
 0x85b   : > { %v859_v46 = vpop.xlane.xlu0 %858 }
 0x85c   : > { %v860_v52 = vadd.f32 %v859_v46, %v1431_v37 }
 0x85e   : > { %863 = vrot.lane.b32.xlu1 %v860_v52, %s1206_s12 }
 0x862   : > { %867 = vrot.lane.b32.xlu1 %v854_v56, %s1207_s13 }
 0x8d0   : > { %v864_v59 = vpop.permute.xlu1 %863  ;;  %87 = sbr.rel (!%p85_p6) target bundleno = 132 (0x84), region = 54 }
 0x8d1   : > { %v870_v61 = vsel %vm781_vm11, %v780_v51, %v864_v59 }
 0x8d4   : > { %v868_v62 = vpop.permute.xlu1 %867 }
 0x8d5   : > { %v871_v50 = vsel %vm677_vm10, %v870_v61, %v868_v62 }
 0x8d6   : > { %873 = vst [vmem:[%s872_s15] sm:$0x1] %v871_v50 }
 0x8d7   :  { %1175 = shalt.err (!%p1172_p11)
}
 0x8d8   :  { %s1176_s21 = scalar_lea.hbm %s1586_s5, 128 }
 0x8d9   :  { %p1177_p12 = scmp.ne.s32.totalorder %s1586_s5, %s1176_s21  ;;  %p1180_p13 = scmp.lt.u32.totalorder %s1176_s21, %s1586_s5 }
 0x8db   :  { %p1182_p0 = pnand %p1180_p13, %p1177_p12 }
 0x8dd   :  { %1185 = shalt.err (!%p1182_p0)
}
 0x8de   :  { %s1210_s1 = smov 16   ;;  %s1211_s2 = smov 1  }
 0x8df   :  { %885 = dma.vmem_to_hbm [thread:$0]  %s880_s17, 128, %s1586_s5, [#allocation6], %s1210_s1, %s1210_s1, %s1211_s2  }
 0x8e0   :  { %1192 = dma.done.wait [#allocation6], 128  }
 0x8e1   :  { %1193 = vsyncadd [#allocation6], 4294967168 }
 0x8e2   :  { %889 = vsyncpa [#allocation6], 1 }

</bundles_post_ra>
